<compile_context>
chip_gen: v5e
topology: v5e:2x2
jax: 0.10.0
libtpu: 0.0.40
codegen_flags: <defaults>
</compile_context>

<pallas_src>
import functools

import jax
import jax.numpy as jnp
import numpy as np
from jax.experimental import pallas as pl
from jax.experimental.pallas import tpu as pltpu


def _reg_head_kernel(x_ref, m_ref,
                     w1_ref, b1_ref, w2_ref, b2_ref, w3_ref, b3_ref,
                     scale_ref, out_ref):
    """One (batch, time-tile) grid step.

    x_ref  : (1, C, TT)  bf16 activations (native NCT layout, T on lanes)
    m_ref  : (1, 1, TT)  f32 mask (lane dense)
    w1_ref : (2C, C)  bf16  = [w1_reg ; w1_iou]             (branch fused)
    w2_ref : (2C, 2C) bf16  = blockdiag(w2_reg, w2_iou)
    w3_ref : (3, 2C)  bf16  = blockdiag(w3_reg(2xC), w3_iou(1xC))
    b*_ref : f32 biases, shape (rows, 1)
    scale  : (1, 1) f32 in SMEM (the learnable Scale() parameter)
    out_ref: (1, 3, TT) f32 -> rows [off0, off1, iou]
    """
    x = x_ref[0]                                     # (C, TT)  bf16
    m = m_ref[0]                                     # (1, TT)  f32

    h = jnp.dot(w1_ref[...], x, preferred_element_type=jnp.float32) + b1_ref[...]
    h = jnp.maximum(h, 0.0).astype(jnp.bfloat16)     # (2C, TT)
    h = jnp.dot(w2_ref[...], h, preferred_element_type=jnp.float32) + b2_ref[...]
    h = jnp.maximum(h, 0.0).astype(jnp.bfloat16)     # (2C, TT)
    y = jnp.dot(w3_ref[...], h, preferred_element_type=jnp.float32) + b3_ref[...]
    # y: (3, TT) f32, rows = [off0, off1, iou]

    y = y * m                                        # * vid_mask.float()
    scaled = jnp.maximum(y * scale_ref[0, 0], 0.0)   # F.relu(Scale(offsets))
    row = jax.lax.broadcasted_iota(jnp.int32, y.shape, 0)
    out_ref[0] = jnp.where(row < 2, scaled, y)       # iou row keeps unscaled value


@functools.lru_cache(maxsize=None)
def _build_call(B, C, Tp, tile):
    """pallas_call for the fused head over the level-concatenated time axis."""
    nT = Tp // tile

    def const(shape):
        nd = len(shape)
        return pl.BlockSpec(shape, lambda b, t, _nd=nd: (0,) * _nd)

    in_specs = [
        pl.BlockSpec((1, C, tile), lambda b, t: (b, 0, t)),   # x    (B, C, Tp) bf16
        pl.BlockSpec((1, 1, tile), lambda b, t: (b, 0, t)),   # mask (B, 1, Tp) f32
        const((2 * C, C)), const((2 * C, 1)),                 # fused layer 1
        const((2 * C, 2 * C)), const((2 * C, 1)),             # fused layer 2
        const((3, 2 * C)), const((3, 1)),                     # fused layer 3
        pl.BlockSpec(memory_space=pltpu.SMEM),                # Scale() scalar
    ]
    out_specs = pl.BlockSpec((1, 3, tile), lambda b, t: (b, 0, t))
    out_shape = jax.ShapeDtypeStruct((B, 3, Tp), jnp.float32)

    return pl.pallas_call(
        _reg_head_kernel,
        grid=(B, nT),
        in_specs=in_specs,
        out_specs=out_specs,
        out_shape=out_shape,
        compiler_params=pltpu.CompilerParams(
            dimension_semantics=("parallel", "parallel"),
            vmem_limit_bytes=32 * 1024 * 1024),
    )


def init_params(key, embd_dim):
    """Deterministic synthetic init.  Conv weights stored torch-style as
    (C_out, C_in) == weight[:, :, 0]; biases are zero (matches __init_weights__);
    the Scale() parameter is initialized to 1.0."""
    C = embd_dim
    ks = jax.random.split(key, 6)

    def conv_w(k, cout, cin):
        bound = 1.0 / np.sqrt(cin)
        return jax.random.uniform(k, (cout, cin), jnp.float32, -bound, bound)

    return dict(
        w1r=conv_w(ks[0], C, C), b1r=jnp.zeros((C,), jnp.float32),
        w2r=conv_w(ks[1], C, C), b2r=jnp.zeros((C,), jnp.float32),
        w3r=conv_w(ks[2], 2, C), b3r=jnp.zeros((2,), jnp.float32),
        w1i=conv_w(ks[3], C, C), b1i=jnp.zeros((C,), jnp.float32),
        w2i=conv_w(ks[4], C, C), b2i=jnp.zeros((C,), jnp.float32),
        w3i=conv_w(ks[5], 1, C), b3i=jnp.zeros((1,), jnp.float32),
        scale=jnp.ones((1, 1), jnp.float32),
    )


def _fuse_params(p):
    """Fuse reg & iou branches into branch-concatenated / block-diagonal weights
    so the kernel runs 3 MXU matmuls instead of 6.  Weights -> bf16, biases f32."""
    C = p['w1r'].shape[1]
    zCC = jnp.zeros((C, C), jnp.float32)
    w1f = jnp.concatenate([p['w1r'], p['w1i']], axis=0)                       # (2C, C)
    w2f = jnp.concatenate(
        [jnp.concatenate([p['w2r'], zCC], axis=1),
         jnp.concatenate([zCC, p['w2i']], axis=1)], axis=0)                   # (2C, 2C)
    w3f = jnp.concatenate(
        [jnp.concatenate([p['w3r'], jnp.zeros((2, C), jnp.float32)], axis=1),
         jnp.concatenate([jnp.zeros((1, C), jnp.float32), p['w3i']], axis=1)],
        axis=0)                                                               # (3, 2C)
    b1f = jnp.concatenate([p['b1r'], p['b1i']])[:, None]                      # (2C, 1)
    b2f = jnp.concatenate([p['b2r'], p['b2i']])[:, None]                      # (2C, 1)
    b3f = jnp.concatenate([p['b3r'], p['b3i']])[:, None]                      # (3, 1)
    return (w1f.astype(jnp.bfloat16), b1f,
            w2f.astype(jnp.bfloat16), b2f,
            w3f.astype(jnp.bfloat16), b3f,
            p['scale'])


def regression_head_forward(fpn_vid, fpn_vid_masks, params, *, time_tile=512):
    """Mirrors RegressionHead.forward (always uses head index 2 / scales[2]).

    All FPN levels are concatenated along time and run through ONE pallas_call;
    per-level (offsets, ious, masks) are sliced back out afterwards."""
    fused = _fuse_params(params)
    B, C, _ = fpn_vid[0].shape
    lens = [int(v.shape[2]) for v in fpn_vid]
    T_total = sum(lens)

    # Time tile: multiple of 128 lanes, capped at `time_tile`, >= 128.
    tile = min(int(time_tile), ((T_total + 127) // 128) * 128)
    tile = max(128, (tile // 128) * 128)
    Tp = ((T_total + tile - 1) // tile) * tile

    x = jnp.concatenate([v.astype(jnp.bfloat16) for v in fpn_vid], axis=2)
    m = jnp.concatenate([mk.astype(jnp.float32) for mk in fpn_vid_masks], axis=2)
    if Tp != T_total:
        pad = ((0, 0), (0, 0), (0, Tp - T_total))
        x = jnp.pad(x, pad)
        m = jnp.pad(m, pad)   # padded columns are masked to zero and sliced off

    out = _build_call(B, C, Tp, tile)(x, m, *fused)   # (B, 3, Tp) f32

    out_offsets, out_ious, out_masks = (), (), ()
    o = 0
    for T_l, vid_mask in zip(lens, fpn_vid_masks):
        out_offsets += (jnp.transpose(out[:, 0:2, o:o + T_l], (0, 2, 1)),)  # (B,T,2)
        out_ious += (out[:, 2, o:o + T_l],)                                  # (B,T)
        out_masks += (vid_mask[:, 0, :],)                                    # (B,T)
        o += T_l
    return out_offsets, out_ious, out_masks


def _reference_forward(fpn_vid, fpn_vid_masks, p):
    """Pure-JAX reference using the unfused weights, with the same bf16-matmul /
    f32-accumulate precision as the kernel (the original PyTorch math is f32;
    bf16 matmuls are an intentional TPU optimization)."""
    def bmm(w, x):   # (O,C) @ (B,C,T) -> (B,O,T)
        return jnp.einsum('oc,bct->bot',
                          w.astype(jnp.bfloat16), x.astype(jnp.bfloat16),
                          preferred_element_type=jnp.float32)

    relu = jax.nn.relu
    scale = p['scale'][0, 0]
    outs_off, outs_iou, outs_m = (), (), ()
    for vid, vid_mask in zip(fpn_vid, fpn_vid_masks):
        m = vid_mask.astype(jnp.float32)                             # (B,1,T)
        h = relu(bmm(p['w1r'], vid) + p['b1r'][None, :, None])
        h = relu(bmm(p['w2r'], h) + p['b2r'][None, :, None])
        off = (bmm(p['w3r'], h) + p['b3r'][None, :, None]) * m
        off = relu(off * scale)                                      # (B,2,T)
        g = relu(bmm(p['w1i'], vid) + p['b1i'][None, :, None])
        g = relu(bmm(p['w2i'], g) + p['b2i'][None, :, None])
        iou = (bmm(p['w3i'], g) + p['b3i'][None, :, None]) * m       # (B,1,T)
        outs_off += (jnp.transpose(off, (0, 2, 1)),)
        outs_iou += (iou[:, 0, :],)
        outs_m += (vid_mask[:, 0, :],)
    return outs_off, outs_iou, outs_m


if __name__ == "__main__":
    key = jax.random.PRNGKey(0)
    embd_dim = 32
    batch = 2
    n_fpn_levels = 3
    level_lens = [16, 8, 4]          # FPN pyramid: T, T/2, T/4

    kx, kp = jax.random.split(key)
    params = init_params(kp, embd_dim)

    fpn_vid, fpn_masks = [], []
    xkeys = jax.random.split(kx, n_fpn_levels)
    for l, T in enumerate(level_lens):
        vid = jax.random.normal(xkeys[l], (batch, embd_dim, T), jnp.float32)
        valid = jnp.array([T, max(T // 2, 1)], dtype=jnp.int32)       # per-sample valid len
        mask = (jnp.arange(T)[None, :] < valid[:, None])[:, None, :]  # (B,1,T) bool
        fpn_vid.append(vid)
        fpn_masks.append(mask)

    offs, ious, masks = regression_head_forward(fpn_vid, fpn_masks, params)
    jax.block_until_ready((offs, ious, masks))

    r_offs, r_ious, r_masks = _reference_forward(fpn_vid, fpn_masks, params)
    for a, b in zip(offs, r_offs):
        np.testing.assert_allclose(np.asarray(a), np.asarray(b), rtol=1e-3, atol=1e-3)
    for a, b in zip(ious, r_ious):
        np.testing.assert_allclose(np.asarray(a), np.asarray(b), rtol=1e-3, atol=1e-3)
    for a, b in zip(masks, r_masks):
        assert np.array_equal(np.asarray(a), np.asarray(b))

    print("KERNEL_OK")
</pallas_src>

<mosaic_0001>
module attributes {stable_mosaic.version = 11 : i64} {
  func.func @_reg_head_kernel(%arg0: i32, %arg1: i32, %arg2: memref<1x32x128xbf16, #tpu.memory_space<vmem>>, %arg3: memref<1x1x128xf32, #tpu.memory_space<vmem>>, %arg4: memref<64x32xbf16, #tpu.memory_space<vmem>>, %arg5: memref<64x1xf32, #tpu.memory_space<vmem>>, %arg6: memref<64x64xbf16, #tpu.memory_space<vmem>>, %arg7: memref<64x1xf32, #tpu.memory_space<vmem>>, %arg8: memref<3x64xbf16, #tpu.memory_space<vmem>>, %arg9: memref<3x1xf32, #tpu.memory_space<vmem>>, %arg10: memref<1x1xf32, #tpu.memory_space<smem>>, %arg11: memref<1x3x128xf32, #tpu.memory_space<vmem>>) attributes {dimension_semantics = [#tpu.dimension_semantics<parallel>, #tpu.dimension_semantics<parallel>], iteration_bounds = array<i64: 2, 1>, scalar_prefetch = 0 : i64, scratch_operands = 0 : i64, tpu.core_type = #tpu.core_type<tc>, window_params = [{transform_indices = @transform_0, window_bounds = array<i64: 1, 32, 128>}, {transform_indices = @transform_1, window_bounds = array<i64: 1, 1, 128>}, {pipeline_mode = #tpu.pipeline_mode<synchronous>, transform_indices = @transform_2, window_bounds = array<i64: 64, 32>}, {pipeline_mode = #tpu.pipeline_mode<synchronous>, transform_indices = @transform_3, window_bounds = array<i64: 64, 1>}, {pipeline_mode = #tpu.pipeline_mode<synchronous>, transform_indices = @transform_4, window_bounds = array<i64: 64, 64>}, {pipeline_mode = #tpu.pipeline_mode<synchronous>, transform_indices = @transform_5, window_bounds = array<i64: 64, 1>}, {pipeline_mode = #tpu.pipeline_mode<synchronous>, transform_indices = @transform_6, window_bounds = array<i64: 3, 64>}, {pipeline_mode = #tpu.pipeline_mode<synchronous>, transform_indices = @transform_7, window_bounds = array<i64: 3, 1>}, {transform_indices = @transform_8, window_bounds = array<i64: 1, 1>}, {transform_indices = @transform_9, window_bounds = array<i64: 1, 3, 128>}]} {
    %c0 = arith.constant 0 : index
    %c0_0 = arith.constant 0 : index
    %c0_1 = arith.constant 0 : index
    %0 = vector.load %arg2[%c0, %c0_0, %c0_1] : memref<1x32x128xbf16, #tpu.memory_space<vmem>>, vector<1x32x128xbf16>
    %1 = vector.shape_cast %0 : vector<1x32x128xbf16> to vector<32x128xbf16>
    %c0_2 = arith.constant 0 : index
    %c0_3 = arith.constant 0 : index
    %c0_4 = arith.constant 0 : index
    %2 = vector.load %arg3[%c0_2, %c0_3, %c0_4] : memref<1x1x128xf32, #tpu.memory_space<vmem>>, vector<1x1x128xf32>
    %3 = vector.shape_cast %2 : vector<1x1x128xf32> to vector<1x128xf32>
    %c0_5 = arith.constant 0 : index
    %c0_6 = arith.constant 0 : index
    %4 = vector.load %arg4[%c0_5, %c0_6] : memref<64x32xbf16, #tpu.memory_space<vmem>>, vector<64x32xbf16>
    %cst = arith.constant dense<0.000000e+00> : vector<64x128xf32>
    %5 = tpu.matmul %4, %1, %cst {dimension_numbers = #tpu.dot_dimension_numbers<[1], [0], [0], [1], [0, 0, 1, 1], [], []>} : vector<64x32xbf16>, vector<32x128xbf16>, vector<64x128xf32> -> vector<64x128xf32>
    %c0_7 = arith.constant 0 : index
    %c0_8 = arith.constant 0 : index
    %6 = vector.load %arg5[%c0_7, %c0_8] : memref<64x1xf32, #tpu.memory_space<vmem>>, vector<64x1xf32>
    %7 = vector.broadcast %6 : vector<64x1xf32> to vector<64x128xf32>
    %8 = arith.addf %5, %7 : vector<64x128xf32>
    %cst_9 = arith.constant 0.000000e+00 : f32
    %9 = vector.broadcast %cst_9 : f32 to vector<64x128xf32>
    %10 = arith.maximumf %8, %9 : vector<64x128xf32>
    %11 = arith.truncf %10 : vector<64x128xf32> to vector<64x128xbf16>
    %c0_10 = arith.constant 0 : index
    %c0_11 = arith.constant 0 : index
    %12 = vector.load %arg6[%c0_10, %c0_11] : memref<64x64xbf16, #tpu.memory_space<vmem>>, vector<64x64xbf16>
    %cst_12 = arith.constant dense<0.000000e+00> : vector<64x128xf32>
    %13 = tpu.matmul %12, %11, %cst_12 {dimension_numbers = #tpu.dot_dimension_numbers<[1], [0], [0], [1], [0, 0, 1, 1], [], []>} : vector<64x64xbf16>, vector<64x128xbf16>, vector<64x128xf32> -> vector<64x128xf32>
    %c0_13 = arith.constant 0 : index
    %c0_14 = arith.constant 0 : index
    %14 = vector.load %arg7[%c0_13, %c0_14] : memref<64x1xf32, #tpu.memory_space<vmem>>, vector<64x1xf32>
    %15 = vector.broadcast %14 : vector<64x1xf32> to vector<64x128xf32>
    %16 = arith.addf %13, %15 : vector<64x128xf32>
    %cst_15 = arith.constant 0.000000e+00 : f32
    %17 = vector.broadcast %cst_15 : f32 to vector<64x128xf32>
    %18 = arith.maximumf %16, %17 : vector<64x128xf32>
    %19 = arith.truncf %18 : vector<64x128xf32> to vector<64x128xbf16>
    %c0_16 = arith.constant 0 : index
    %c0_17 = arith.constant 0 : index
    %20 = vector.load %arg8[%c0_16, %c0_17] : memref<3x64xbf16, #tpu.memory_space<vmem>>, vector<3x64xbf16>
    %cst_18 = arith.constant dense<0.000000e+00> : vector<3x128xf32>
    %21 = tpu.matmul %20, %19, %cst_18 {dimension_numbers = #tpu.dot_dimension_numbers<[1], [0], [0], [1], [0, 0, 1, 1], [], []>} : vector<3x64xbf16>, vector<64x128xbf16>, vector<3x128xf32> -> vector<3x128xf32>
    %c0_19 = arith.constant 0 : index
    %c0_20 = arith.constant 0 : index
    %22 = vector.load %arg9[%c0_19, %c0_20] : memref<3x1xf32, #tpu.memory_space<vmem>>, vector<3x1xf32>
    %23 = vector.broadcast %22 : vector<3x1xf32> to vector<3x128xf32>
    %24 = arith.addf %21, %23 : vector<3x128xf32>
    %25 = vector.broadcast %3 : vector<1x128xf32> to vector<3x128xf32>
    %26 = arith.mulf %24, %25 : vector<3x128xf32>
    %c0_21 = arith.constant 0 : index
    %c0_22 = arith.constant 0 : index
    %27 = memref.load %arg10[%c0_21, %c0_22] : memref<1x1xf32, #tpu.memory_space<smem>>
    %28 = vector.broadcast %27 : f32 to vector<3x128xf32>
    %29 = arith.mulf %26, %28 : vector<3x128xf32>
    %cst_23 = arith.constant 0.000000e+00 : f32
    %30 = vector.broadcast %cst_23 : f32 to vector<3x128xf32>
    %31 = arith.maximumf %29, %30 : vector<3x128xf32>
    %32 = tpu.iota {dimensions = array<i32: 0>} : vector<3x128xi32>
    %c2_i32 = arith.constant 2 : i32
    %33 = vector.broadcast %c2_i32 : i32 to vector<3x128xi32>
    %34 = arith.cmpi slt, %32, %33 : vector<3x128xi32>
    %35 = arith.select %34, %31, %26 : vector<3x128xi1>, vector<3x128xf32>
    %c0_24 = arith.constant 0 : index
    %c0_25 = arith.constant 0 : index
    %c0_26 = arith.constant 0 : index
    %36 = vector.load %arg11[%c0_24, %c0_25, %c0_26] : memref<1x3x128xf32, #tpu.memory_space<vmem>>, vector<1x3x128xf32>
    %37 = vector.shape_cast %36 : vector<1x3x128xf32> to vector<3x128xf32>
    %38 = vector.shape_cast %35 : vector<3x128xf32> to vector<1x3x128xf32>
    tpu.vector_store %arg11[%c0_24, %c0_25, %c0_26], %38 {strides = array<i32>} : memref<1x3x128xf32, #tpu.memory_space<vmem>>, vector<1x3x128xf32>,
    return
  }
  func.func @transform_0(%arg0: i32, %arg1: i32) -> (i32, i32, i32) {
    %c0_i32 = arith.constant 0 : i32
    %c0_i32_0 = arith.constant 0 : i32
    return %arg0, %c0_i32, %arg1 : i32, i32, i32
  }
  func.func @transform_1(%arg0: i32, %arg1: i32) -> (i32, i32, i32) {
    %c0_i32 = arith.constant 0 : i32
    %c0_i32_0 = arith.constant 0 : i32
    return %arg0, %c0_i32, %arg1 : i32, i32, i32
  }
  func.func @transform_2(%arg0: i32, %arg1: i32) -> (i32, i32) {
    %c0_i32 = arith.constant 0 : i32
    %c0_i32_0 = arith.constant 0 : i32
    %c0_i32_1 = arith.constant 0 : i32
    return %c0_i32, %c0_i32_0 : i32, i32
  }
  func.func @transform_3(%arg0: i32, %arg1: i32) -> (i32, i32) {
    %c0_i32 = arith.constant 0 : i32
    %c0_i32_0 = arith.constant 0 : i32
    %c0_i32_1 = arith.constant 0 : i32
    return %c0_i32, %c0_i32_0 : i32, i32
  }
  func.func @transform_4(%arg0: i32, %arg1: i32) -> (i32, i32) {
    %c0_i32 = arith.constant 0 : i32
    %c0_i32_0 = arith.constant 0 : i32
    %c0_i32_1 = arith.constant 0 : i32
    return %c0_i32, %c0_i32_0 : i32, i32
  }
  func.func @transform_5(%arg0: i32, %arg1: i32) -> (i32, i32) {
    %c0_i32 = arith.constant 0 : i32
    %c0_i32_0 = arith.constant 0 : i32
    %c0_i32_1 = arith.constant 0 : i32
    return %c0_i32, %c0_i32_0 : i32, i32
  }
  func.func @transform_6(%arg0: i32, %arg1: i32) -> (i32, i32) {
    %c0_i32 = arith.constant 0 : i32
    %c0_i32_0 = arith.constant 0 : i32
    %c0_i32_1 = arith.constant 0 : i32
    return %c0_i32, %c0_i32_0 : i32, i32
  }
  func.func @transform_7(%arg0: i32, %arg1: i32) -> (i32, i32) {
    %c0_i32 = arith.constant 0 : i32
    %c0_i32_0 = arith.constant 0 : i32
    %c0_i32_1 = arith.constant 0 : i32
    return %c0_i32, %c0_i32_0 : i32, i32
  }
  func.func @transform_8(%arg0: i32, %arg1: i32) -> (i32, i32) {
    %c0_i32 = arith.constant 0 : i32
    %c0_i32_0 = arith.constant 0 : i32
    %c0_i32_1 = arith.constant 0 : i32
    return %c0_i32, %c0_i32_0 : i32, i32
  }
  func.func @transform_9(%arg0: i32, %arg1: i32) -> (i32, i32, i32) {
    %c0_i32 = arith.constant 0 : i32
    %c0_i32_0 = arith.constant 0 : i32
    return %arg0, %c0_i32, %arg1 : i32, i32, i32
  }
}

</mosaic_0001>

<bundles_post_ra>
// kernel: tpu_custom_call.1
= control target key start
LH: loop header
LB: loop body
LE: loop exit
PB: predicated region body
PF: predicated region fallthrough
CT: control target
= control target key end

     0   :  { %s978_s11 = smov 0   ;;  %s980_s12 = smov 0   ;;  %s1111_s0 = inlined_call_operand.vmem [shape: bf16[2,32,128], index: 0, kind: input, shape index: {}]   ;;  %s1112_s1 = inlined_call_operand.vmem [shape: f32[2,1,128], index: 1, kind: input, shape index: {}]   ;;  %s1113_s2 = inlined_call_operand.vmem [shape: bf16[64,32], index: 2, kind: input, shape index: {}]   ;;  %s1114_s3 = inlined_call_operand.vmem [shape: f32[64,1], index: 3, kind: input, shape index: {}]   ;;  %s1115_s4 = inlined_call_operand.vmem [shape: bf16[64,64], index: 4, kind: input, shape index: {}]   ;;  %s1116_s5 = inlined_call_operand.vmem [shape: f32[64,1], index: 5, kind: input, shape index: {}]   ;;  %s1117_s6 = inlined_call_operand.vmem [shape: bf16[3,64], index: 6, kind: input, shape index: {}]   ;;  %s1118_s7 = inlined_call_operand.vmem [shape: f32[3,1], index: 7, kind: input, shape index: {}]   ;;  %s1119_s8 = inlined_call_operand.<no memory space> [shape: f32[1,1], index: 8, kind: input, shape index: {}]   ;;  %s1120_s9 = inlined_call_operand.vmem [shape: f32[2,3,128], index: 9, kind: output, shape index: {}]  }
   0x1   :  { %14 = sst [smem:[#allocation2]] %s1119_s8  ;;  %s982_s13 = smov 0  }
   0x2 LB: > { %s32_s8 = sadd.s32 1, %s918_s12  ;;  %p795_p0 = scmp.ge.s32.totalorder %s922_s13, 1  ;;  %s922_s13 = sphi %s982_s13, %s20_s13   ;;  %s918_s12 = sphi %s980_s12, %s1122_s12   ;;  %s914_s11 = sphi %s978_s11, %s1121_s11  }
   0x3   : > { %p34_p1 = scmp.ge.s32.totalorder %s32_s8, 2  ;;  %p320_p2 = scmp.lt.s32.totalorder %s922_s13, 3 }
   0x5   : > { %s1124_s8 = smov (%p34_p1, %s32_s8), 0  ;;  %p321_p3 = pnand %p795_p0, %p320_p2 }
   0x6   : > { %p367_p4 = scmp.lt.s32.totalorder (!%p321_p3), %s914_s11, 1  ;;  %s693_s19 = sld [smem:[#allocation2]] (!%p321_p3) }
   0x7   : > { %324 = sbr.rel (%p321_p3) target bundleno = 526 (0x20e), region = 56 }
   0xc   : > { %v408_v0 = vld [vmem:[%s1114_s3 + $0x30] sm:$0xff]  ;;  %v924_v1 = vmov 0   ;;  %v406_v2 = vld [vmem:[%s1114_s3 + $0x20] sm:$0xff]  ;;  %s1126_s11 = smov (!%p367_p4, %s914_s11), 1  ;;  %v409_v4 = vld [vmem:[%s1114_s3 + $0x38] sm:$0xff]  ;;  %vm482_vm0 = vcmask 261120  }
   0xd   : > { %896 = vset.pattern.permute.xlu0 %v924_v1  ;;  %897 = vset.pattern.permute.xlu1 %v924_v1  ;;  %s850_s18 = sshll.u32 %s1126_s11, 4  ;;  %v407_v5 = vld [vmem:[%s1114_s3 + $0x28] sm:$0xff]  ;;  %v853_v7 = vld [vmem:[%s1113_s2] sm:$0xff]  ;;  %v856_v8 = vld [vmem:[%s1113_s2 + $0x18] sm:$0xff]  ;;  %vm612_vm1 = vcmask 523264   ;;  %s380_s16 = scalar_lea.vmem %s1112_s1, %s1126_s11 }
   0xe   : > { %442 = vperm.xlu0 %896, %v408_v0   ;;  %432 = vperm.xlu1 %897, %v406_v2   ;;  %s374_s21 = scalar_lea.vmem %s1111_s0, %s850_s18  ;;  %v402_v9 = vld [vmem:[%s1114_s3] sm:$0xff]  ;;  %v403_v10 = vld [vmem:[%s1114_s3 + $0x8] sm:$0xff]  ;;  %v404_v11 = vld [vmem:[%s1114_s3 + $0x10] sm:$0xff]  ;;  %s798_s22 = sshll.u32 %s1126_s11, 2 }
   0xf   : > { %898 = vset.pattern.permute.xlu2 %v924_v1  ;;  %v852_v3 = vld [vmem:[%s374_s21 + $0x8] sm:$0xff]  ;;  %v851_v6 = vld [vmem:[%s374_s21] sm:$0xff]  ;;  %v405_v12 = vld [vmem:[%s1114_s3 + $0x18] sm:$0xff]  ;;  %s387_s25 = scalar_lea.vmem %s1120_s9, %s798_s22 }
  0x10   : > { %501 = vmatpush.bf16.msra.mxu0 %v852_v3  ;;  %861 = vmatpush.bf16.msra.mxu1 %v852_v3  ;;  %v551_v13 = vld [vmem:[%s1116_s5 + $0x38] sm:$0xff]  ;;  %v548_v14 = vld [vmem:[%s1116_s5 + $0x20] sm:$0xff]  ;;  %v854_v15 = vld [vmem:[%s1113_s2 + $0x8] sm:$0xff] }
  0x11   : > { %422 = vperm.xlu2 %898, %v404_v11   ;;  %v550_v16 = vld [vmem:[%s1116_s5 + $0x30] sm:$0xff]  ;;  %v547_v18 = vld [vmem:[%s1116_s5 + $0x18] sm:$0xff]  ;;  %v549_v19 = vld [vmem:[%s1116_s5 + $0x28] sm:$0xff] }
  0x12   : > { %v546_v17 = vld [vmem:[%s1116_s5 + $0x10] sm:$0xff]  ;;  %v545_v20 = vld [vmem:[%s1116_s5 + $0x8] sm:$0xff]  ;;  %v667_v21 = vld [vmem:[%s1118_s7] sm:$0x7] }
  0x13   : > { %v855_v22 = vld [vmem:[%s1113_s2 + $0x10] sm:$0xff]  ;;  %v544_v23 = vld [vmem:[%s1116_s5] sm:$0xff]  ;;  %v858_v61 = vld [vmem:[%s1115_s4 + $0x8] sm:$0xff] }
  0x14   : > { %502 = vmatpush.bf16.msra.mxu0 %v851_v6  ;;  %862 = vmatpush.bf16.msra.mxu1 %v851_v6  ;;  %v857_v60 = vld [vmem:[%s1115_s4] sm:$0xff]  ;;  %v859_v62 = vld [vmem:[%s1115_s4 + $0x10] sm:$0xff]  ;;  %v860_v63 = vld [vmem:[%s1115_s4 + $0x18] sm:$0xff] }
  0x16   : > { %447 = vperm.xlu0 %896, %v409_v4   ;;  %437 = vperm.xlu1 %897, %v407_v5  }
  0x17   : > { %823 = vmatmul.msk.bf16.vlgmr.msra.gmra.mxu0 %vm482_vm0, %v853_v7  ;;  %826 = vmatmul.msk.bf16.vlgmr.msra.gmra.mxu1 %vm482_vm0, %v856_v8 }
  0x19   : > { %427 = vperm.xlu2 %898, %v405_v12  }
  0x1e   : > { %412 = vperm.xlu0 %896, %v402_v9   ;;  %417 = vperm.xlu1 %897, %v403_v10  }
  0x21   : > { %584 = vperm.xlu2 %898, %v550_v16  }
  0x26   : > { %589 = vperm.xlu0 %896, %v551_v13   ;;  %574 = vperm.xlu1 %897, %v548_v14  }
  0x27   : > { %824 = vmatmul.msk.bf16.gmra.mxu0 %vm482_vm0, %v854_v15 }
  0x29   : > { %579 = vperm.xlu2 %898, %v549_v19  }
  0x2e   : > { %564 = vperm.xlu0 %896, %v546_v17   ;;  %569 = vperm.xlu1 %897, %v547_v18  }
  0x31   : > { %554 = vperm.xlu2 %898, %v544_v23  }
  0x36   : > { %559 = vperm.xlu0 %896, %v545_v20   ;;  %670 = vperm.xlu1 %897, %v667_v21  }
  0x37   : > { %825 = vmatmul.msk.bf16.gmra.mxu0 %vm482_vm0, %v855_v22 }
  0x6b   : > { %v423_v38 = vpop.permute.xlu2 %422 }
  0x73   : > { %v428_v42 = vpop.permute.xlu2 %427 }
  0x7b   : > { %v585_v3 = vpop.permute.xlu2 %584 }
  0x80   : > { %v443_v24 = vpop.permute.xlu0 %442  ;;  %v433_v36 = vpop.permute.xlu1 %432 }
  0x83   : > { %v580_v10 = vpop.permute.xlu2 %579 }
  0x88   : > { %v448_v29 = vpop.permute.xlu0 %447  ;;  %v438_v39 = vpop.permute.xlu1 %437 }
  0x90   : > { %v418_v46 = vpop.permute.xlu1 %417  ;;  %v413_v50 = vpop.permute.xlu0 %412 }
  0x94   : > { %v504_v25 = vpop.f32.mrf.mxu0  ;;  %v519_v26 = vpop.f32.mrf.mxu1 }
  0x95   : > { %v520_v27 = vadd.f32 %v519_v26, %v443_v24  ;;  %v505_v54 = vadd.f32 %v504_v25, %v413_v50 }
  0x97   : > { %v530_v31 = vmax.f32 %v520_v27, 0.0  ;;  %v524_v58 = vmax.f32 %v505_v54, 0.0 }
  0x98   : > { %v590_v2 = vpop.permute.xlu0 %589  ;;  %v575_v6 = vpop.permute.xlu1 %574 }
  0x9c   : > { %v506_v28 = vpop.f32.mrf.mxu0  ;;  %v521_v30 = vpop.f32.mrf.mxu1 }
  0x9d   : > { %v522_v32 = vadd.f32 %v521_v30, %v448_v29  ;;  %v507_v51 = vadd.f32 %v506_v28, %v418_v46  ;;  %v555_v29 = vpop.permute.xlu2 %554 }
  0x9f   : > { %v531_v33 = vmax.f32 %v522_v32, 0.0  ;;  %v525_v56 = vmax.f32 %v507_v51, 0.0 }
  0xa0   : > { %v565_v8 = vpop.permute.xlu0 %564  ;;  %v570_v18 = vpop.permute.xlu1 %569 }
  0xa1   : > { %v535_v34 = vpack.c.bf16 %v531_v33, %v530_v31  ;;  %v532_v59 = vpack.c.bf16 %v525_v56, %v524_v58 }
  0xa3   : > { %629 = vmatpush.bf16.msrb.mxu1 %v535_v34  ;;  %863 = vmatpush.bf16.msra.mxu2 %v535_v34 }
  0xa4   : > { %v509_v35 = vpop.f32.mrf.mxu0  ;;  %864 = vmatpush.bf16.msra.mxu3 %v535_v34 }
  0xa5   : > { %v510_v47 = vadd.f32 %v509_v35, %v423_v38  ;;  %v899_v38 = vld [vmem:[%s380_s16] ss:$0 sm:$0xff] }
  0xa7   : > { %v526_v55 = vmax.f32 %v510_v47, 0.0 }
  0xa8   : > { %v560_v25 = vpop.permute.xlu0 %559 }
  0xac   : > { %v511_v37 = vpop.f32.mrf.mxu0 }
  0xad   : > { %v512_v44 = vadd.f32 %v511_v37, %v428_v42  ;;  %v697_v37 = vlaneseq  ;;  %v694_v42 = vstv %s693_s19 }
  0xaf   : > { %v527_v52 = vmax.f32 %v512_v44, 0.0 }
  0xb1   : > { %v533_v57 = vpack.c.bf16 %v527_v52, %v526_v55 }
  0xb4   : > { %v514_v40 = vpop.f32.mrf.mxu0 }
  0xb5   : > { %v515_v41 = vadd.f32 %v514_v40, %v433_v36  ;;  %v666_v36 = vld [vmem:[%s1117_s6] sm:$0x3] }
  0xb7   : > { %v528_v48 = vmax.f32 %v515_v41, 0.0 }
  0xbc   : > { %v516_v43 = vpop.f32.mrf.mxu0 }
  0xbd   : > { %v517_v45 = vadd.f32 %v516_v43, %v438_v39  ;;  %v671_v39 = vpop.permute.xlu1 %670  ;;  %v698_v43 = vshrl.u32 %v697_v37, 7 }
  0xbf   : > { %v529_v49 = vmax.f32 %v517_v45, 0.0  ;;  %vm699_vm2 = vcmp.lt.s32.totalorder %v698_v43, 2 }
  0xc1   : > { %v534_v53 = vpack.c.bf16 %v529_v49, %v528_v48 }
  0xc3   : > { %630 = vmatpush.bf16.msrb.mxu1 %v534_v53  ;;  %865 = vmatpush.bf16.msra.mxu2 %v534_v53 }
  0xc4   : > { %866 = vmatpush.bf16.msra.mxu3 %v534_v53 }
  0xc7   : > { %631 = vmatpush.bf16.msrb.mxu1 %v533_v57  ;;  %867 = vmatpush.bf16.msra.mxu2 %v533_v57 }
  0xc8   : > { %868 = vmatpush.bf16.msra.mxu3 %v533_v57 }
  0xcb   : > { %632 = vmatpush.bf16.msrb.mxu1 %v532_v59  ;;  %869 = vmatpush.bf16.msra.mxu2 %v532_v59 }
  0xcc   : > { %870 = vmatpush.bf16.msra.mxu3 %v532_v59 }
  0xce   : > { %843 = vmatmul.msk.bf16.vlgmr.msrb.gmra.mxu1 %vm612_vm1, %v857_v60  ;;  %844 = vmatmul.msk.bf16.vlgmr.msra.gmra.mxu2 %vm612_vm1, %v858_v61 }
  0xcf   : > { %845 = vmatmul.msk.bf16.vlgmr.msra.gmra.mxu3 %vm612_vm1, %v859_v62 }
  0xdf   : > { %846 = vmatmul.msk.bf16.gmra.mxu3 %vm612_vm1, %v860_v63 }
 0x14b   : > { %v634_v7 = vpop.f32.mrf.mxu1 }
 0x14c   : > { %v635_v30 = vadd.f32 %v634_v7, %v555_v29 }
 0x14e   : > { %v654_v34 = vmax.f32 %v635_v30, 0.0 }
 0x151   : > { %v639_v4 = vpop.f32.mrf.mxu2 }
 0x152   : > { %v644_v0 = vpop.f32.mrf.mxu3  ;;  %v640_v23 = vadd.f32 %v639_v4, %v565_v8 }
 0x153   : > { %v645_v15 = vadd.f32 %v644_v0, %v575_v6  ;;  %v636_v22 = vpop.f32.mrf.mxu1 }
 0x154   : > { %v637_v26 = vadd.f32 %v636_v22, %v560_v25  ;;  %v656_v31 = vmax.f32 %v640_v23, 0.0 }
 0x155   : > { %v658_v24 = vmax.f32 %v645_v15, 0.0 }
 0x156   : > { %v655_v32 = vmax.f32 %v637_v26, 0.0 }
 0x158   : > { %v662_v35 = vpack.c.bf16 %v655_v32, %v654_v34 }
 0x159   : > { %v641_v14 = vpop.f32.mrf.mxu2 }
 0x15a   : > { %v646_v1 = vpop.f32.mrf.mxu3  ;;  %v642_v19 = vadd.f32 %v641_v14, %v570_v18 }
 0x15b   : > { %v647_v12 = vadd.f32 %v646_v1, %v580_v10 }
 0x15c   : > { %v657_v27 = vmax.f32 %v642_v19, 0.0 }
 0x15d   : > { %v659_v20 = vmax.f32 %v647_v12, 0.0 }
 0x15e   : > { %v663_v33 = vpack.c.bf16 %v657_v27, %v656_v31 }
 0x15f   : > { %v664_v28 = vpack.c.bf16 %v659_v20, %v658_v24 }
 0x162   : > { %v649_v5 = vpop.f32.mrf.mxu3 }
 0x163   : > { %v650_v9 = vadd.f32 %v649_v5, %v585_v3 }
 0x165   : > { %v660_v16 = vmax.f32 %v650_v9, 0.0 }
 0x16a   : > { %v651_v11 = vpop.f32.mrf.mxu3 }
 0x16b   : > { %v652_v13 = vadd.f32 %v651_v11, %v590_v2 }
 0x16d   : > { %v661_v17 = vmax.f32 %v652_v13, 0.0 }
 0x16f   : > { %v665_v21 = vpack.c.bf16 %v661_v17, %v660_v16 }
 0x171   : > { %680 = vmatpush.bf16.msrb.mxu2 %v665_v21 }
 0x175   : > { %681 = vmatpush.bf16.msrb.mxu2 %v664_v28 }
 0x179   : > { %682 = vmatpush.bf16.msrb.mxu2 %v663_v33 }
 0x17d   : > { %683 = vmatpush.bf16.msrb.mxu2 %v662_v35 }
 0x180   : > { %847 = vmatmul.msk.bf16.vlgmr.msrb.gmra.mxu2 %vm612_vm1, %v666_v36 }
 0x203   : > { %v685_v40 = vpop.f32.mrf.mxu2 }
 0x204   : > { %v686_v41 = vadd.f32 %v685_v40, %v671_v39 }
 0x206   : > { %v692_v44 = vmul.f32 %v899_v38, %v686_v41 }
 0x208   : > { %v695_v45 = vmul.f32 %v694_v42, %v692_v44 }
 0x20a   : > { %v696_v46 = vmax.f32 %v695_v45, 0.0 }
 0x20b   : > { %v687_v47 = vpop.f32.mrf.mxu2 }
 0x20c   : > { %v700_v48 = vsel %vm699_vm2, %v696_v46, %v692_v44 }
 0x20d   : > { %701 = vst [vmem:[%s387_s25] sm:$0x7] %v700_v48 }
 0x20e PF: > { %s20_s13 = sadd.s32 1, %s922_s13   ;;  %s1121_s11 = smov %s918_s12 }
 0x20f   : > { %p17_p5 = scmp.ge.s32.totalorder %s20_s13, 4   ;;  %s1122_s12 = smov %s1124_s8 }
 0x211   :  { %19 = sbr.rel (!%p17_p5) target bundleno = 2 (0x2), region = 89 }

</bundles_post_ra>
